<compile_context>
chip_gen: v5e
topology: v5e:2x2
jax: 0.10.0
libtpu: 0.0.40
codegen_flags: <defaults>
</compile_context>

<pallas_src>
import jax
import jax.numpy as jnp
from jax import lax
from jax.experimental import pallas as pl
from jax.experimental.pallas import tpu as pltpu

# ----------------------------- model config ---------------------------------
VOCAB = 50
EMB_DIM = 64            # fixed by the conv kernel widths (3,64)/(5,64)/(7,64)
MAX_LEN = 16
HIDDEN_DIM = 32
CLASS_NUM = 4
BATCH = 2
KSIZES = (3, 5, 7)
KMAX = max(KSIZES)

T_PAD = 16              # per-batch time rows, padded 14 -> 16 (tile aligned)
ROWS = BATCH * T_PAD    # 32 conv-matmul rows
VP = 128                # vocab padded to one full lane width (one-hot width)
HP = 128                # 3*HIDDEN_DIM = 96 channels padded to a full lane width
ONE_COL = 3 * HIDDEN_DIM  # column 96 carries a constant 1.0 -> classifier bias via wl
BP = 8                  # output rows padded to a full sublane tile


# ------------------------------ Pallas kernel --------------------------------
def textcnn_kernel(ids_ref, wp_ref, mask_ref, wl_ref, out_ref):
    # ids_ref : (ROWS, KMAX) int32   token id of tap dk for row (b*T_PAD + t); -1 = pad
    # wp_ref  : (KMAX, VP, HP) bf16  emb-precomposed conv weights (+ conv bias in tap 0)
    # mask_ref: (ROWS, HP) f32       1.0 where the conv window is valid, else 0.0
    # wl_ref  : (HP, HP)  bf16       classifier weight (+ bias in row ONE_COL)
    # out_ref : (BP, HP)  f32        lane-dense logits slab
    ids = ids_ref[...]                                             # (32, 7) int32
    viota = lax.broadcasted_iota(jnp.int32, (ROWS, VP), 1)         # (32, 128)

    # gather + im2col + conv: 7 one-hot row-select matmuls, f32 accumulation
    acc = jnp.zeros((ROWS, HP), jnp.float32)
    for dk in range(KMAX):
        onehot = jnp.where(ids[:, dk:dk + 1] == viota, 1.0, 0.0).astype(jnp.bfloat16)
        acc = acc + jnp.dot(onehot, wp_ref[dk], preferred_element_type=jnp.float32)

    # ReLU, then zero invalid conv-tail rows (valid because ReLU output >= 0)
    acc = jnp.maximum(acc, 0.0) * mask_ref[...]                    # (32, 128) f32

    # max-pool over time per batch element; 16-row blocks are tile-aligned static slices
    feats = [jnp.max(acc[b * T_PAD:(b + 1) * T_PAD, :], axis=0, keepdims=True)
             for b in range(BATCH)]                                # each (1, 128)
    feats.append(jnp.zeros((BP - BATCH, HP), jnp.float32))         # pad rows to 8
    featp = jnp.concatenate(feats, axis=0)                         # (8, 128); col 96 == 1

    # classifier (bias carried by wl row ONE_COL); full (8,128) unmasked store
    out_ref[...] = jnp.dot(featp.astype(jnp.bfloat16), wl_ref[...],
                           preferred_element_type=jnp.float32)


# ------------------------- one-time parameter prep ----------------------------
def prepare_params(emb_table, conv_ws, conv_bs, w_lin, b_lin):
    """Hoisted out of the forward pass: fuse embedding table into conv weights,
    pad channels/vocab, fold biases, build the validity mask, cast to bf16."""
    E, H, C, V = EMB_DIM, HIDDEN_DIM, CLASS_NUM, VOCAB

    emb_pad = jnp.zeros((VP, E), jnp.float32).at[:V, :].set(emb_table.astype(jnp.float32))

    # per-tap precomposed conv weight: wp[dk, v, h] = sum_e emb[v,e] * w_branch[dk,e,h]
    wp = jnp.zeros((KMAX, VP, HP), jnp.float32)
    for bi, (w, b, k) in enumerate(zip(conv_ws, conv_bs, KSIZES)):
        c0 = bi * H
        for dk in range(k):
            wp = wp.at[dk, :, c0:c0 + H].set(emb_pad @ w[dk])      # f32 contraction
        # conv bias folded into tap 0 (tap 0 always hits a real token for every row)
        wp = wp.at[0, :V, c0:c0 + H].add(jnp.broadcast_to(b.reshape(1, H), (V, H)))
    # constant-1 feature column (carries the classifier bias through the max-pool)
    wp = wp.at[0, :V, ONE_COL].set(1.0)

    # classifier weight with bias folded into row ONE_COL; channel/class padded to 128
    wl = jnp.zeros((HP, HP), jnp.float32)
    wl = wl.at[:3 * H, :C].set(w_lin.T.astype(jnp.float32))
    wl = wl.at[ONE_COL, :C].set(b_lin.reshape(-1))

    # precomputed validity mask: row (b*T_PAD + t), column block limits 14/12/10, col>=96 always valid
    limits = jnp.full((HP,), T_PAD, jnp.int32)
    for bi, k in enumerate(KSIZES):
        limits = limits.at[bi * H:(bi + 1) * H].set(MAX_LEN - k + 1)
    t = jnp.arange(T_PAD, dtype=jnp.int32)
    mask = (t[:, None] < limits[None, :]).astype(jnp.float32)      # (T_PAD, HP)
    mask = jnp.tile(mask, (BATCH, 1))                              # (ROWS, HP)

    return {"wp": wp.astype(jnp.bfloat16),
            "wl": wl.astype(jnp.bfloat16),
            "mask": mask}


# ------------------------------- forward wrapper -------------------------------
def _forward(params, batch_idx):
    B, L = batch_idx.shape
    # tiny glue: id-window table ids[r = b*T_PAD + t, dk] = token at position t+dk (or -1)
    ids_pad = jnp.full((B, T_PAD + KMAX - 1), -1, jnp.int32)
    ids_pad = ids_pad.at[:, :L].set(batch_idx.astype(jnp.int32))
    ids = jnp.stack([ids_pad[:, dk:dk + T_PAD] for dk in range(KMAX)], axis=-1)
    ids = ids.reshape(B * T_PAD, KMAX)                             # (32, 7)

    out = pl.pallas_call(
        textcnn_kernel,
        out_shape=jax.ShapeDtypeStruct((BP, HP), jnp.float32),
        grid_spec=pltpu.PrefetchScalarGridSpec(
            num_scalar_prefetch=0,
            grid=(1,),           # whole (tiny) batch in one step; see v7x note below
            in_specs=[
                pl.BlockSpec((ROWS, KMAX), lambda i: (0, 0)),
                pl.BlockSpec((KMAX, VP, HP), lambda i: (0, 0, 0)),
                pl.BlockSpec((ROWS, HP), lambda i: (0, 0)),
                pl.BlockSpec((HP, HP), lambda i: (0, 0)),
            ],
            out_specs=pl.BlockSpec((BP, HP), lambda i: (0, 0)),
        ),
        # v7x note: at BATCH=2 a single grid step is best; if the batch grows, switch to
        # grid=(cdiv(B, B_tile),) with dimension_semantics=("parallel",) to use both TCs.
        compiler_params=pltpu.CompilerParams(
            dimension_semantics=("arbitrary",)),
    )(ids, params["wp"], params["mask"], params["wl"])
    return out[:BATCH, :CLASS_NUM]


textcnn_forward = jax.jit(_forward)


# ----------------------------- pure-JAX reference ----------------------------
def reference_forward(emb_table, batch_idx, conv_ws, conv_bs, w_lin, b_lin):
    emb = emb_table[batch_idx]                                     # (B, L, E) f32
    B, L, E = emb.shape
    feats = []
    for (w, b, k) in zip(conv_ws, conv_bs, KSIZES):
        l_out = L - k + 1
        acc = jnp.zeros((B, l_out, w.shape[2]), jnp.float32)
        for dk in range(k):
            acc = acc + jnp.einsum("ble,eh->blh", emb[:, dk:dk + l_out, :], w[dk])
        acc = jnp.maximum(acc + b.reshape(1, 1, -1), 0.0)
        feats.append(acc.max(axis=1))                              # (B, H)
    feat = jnp.concatenate(feats, axis=1)                          # (B, 3H)
    return feat @ w_lin.T + b_lin.reshape(1, -1)


# ---------------------------------- main --------------------------------------
if __name__ == "__main__":
    key = jax.random.PRNGKey(0)
    keys = jax.random.split(key, 12)

    # Deterministic parameter init (shapes follow the nn.Module __init__).
    emb_table = jax.random.normal(keys[0], (VOCAB, EMB_DIM), jnp.float32) * 0.1

    def conv_params(kw, kb, k):
        # torch Conv2d weight is (H, 1, k, E); we store it as (k, E, H).
        w_torch = jax.random.normal(kw, (HIDDEN_DIM, 1, k, EMB_DIM), jnp.float32) * 0.05
        b = jax.random.normal(kb, (1, HIDDEN_DIM), jnp.float32) * 0.01
        w = jnp.transpose(w_torch[:, 0], (1, 2, 0))                # (k, E, H)
        return w, b

    w1, b1 = conv_params(keys[1], keys[2], KSIZES[0])
    w2, b2 = conv_params(keys[3], keys[4], KSIZES[1])
    w3, b3 = conv_params(keys[5], keys[6], KSIZES[2])
    conv_ws, conv_bs = [w1, w2, w3], [b1, b2, b3]

    # torch Linear weight is (C, 3H); bias (1, C).
    w_lin = jax.random.normal(keys[7], (CLASS_NUM, 3 * HIDDEN_DIM), jnp.float32) * 0.05
    b_lin = jax.random.normal(keys[8], (1, CLASS_NUM), jnp.float32) * 0.01

    # Inputs: token ids (B, L)  ==  PyTorch batch_idx of shape (B, 1, L) squeezed.
    batch_idx = jax.random.randint(keys[9], (BATCH, MAX_LEN), 0, VOCAB)

    # One-time weight preparation (hoisted out of the forward pass).
    params = prepare_params(emb_table, conv_ws, conv_bs, w_lin, b_lin)
    params = jax.tree_util.tree_map(jax.block_until_ready, params)

    out = textcnn_forward(params, batch_idx)
    out = jax.block_until_ready(out)

    ref = reference_forward(emb_table, batch_idx, conv_ws, conv_bs, w_lin, b_lin)
    assert out.shape == (BATCH, CLASS_NUM)
    # bf16 MXU operands (f32 accumulation) vs. f32 reference -> loosened tolerance.
    assert jnp.allclose(out, ref, atol=1e-2, rtol=1e-2), (out, ref)

    print("KERNEL_OK")
</pallas_src>

<mosaic_0001>
module attributes {stable_mosaic.version = 11 : i64} {
  func.func @textcnn_kernel(%arg0: i32, %arg1: memref<32x7xi32, #tpu.memory_space<vmem>>, %arg2: memref<7x128x128xbf16, #tpu.memory_space<vmem>>, %arg3: memref<32x128xf32, #tpu.memory_space<vmem>>, %arg4: memref<128x128xbf16, #tpu.memory_space<vmem>>, %arg5: memref<8x128xf32, #tpu.memory_space<vmem>>) attributes {dimension_semantics = [#tpu.dimension_semantics<arbitrary>], iteration_bounds = array<i64: 1>, scalar_prefetch = 0 : i64, scratch_operands = 0 : i64, tpu.core_type = #tpu.core_type<tc>, window_params = [{pipeline_mode = #tpu.pipeline_mode<synchronous>, transform_indices = @transform_0, window_bounds = array<i64: 32, 7>}, {pipeline_mode = #tpu.pipeline_mode<synchronous>, transform_indices = @transform_1, window_bounds = array<i64: 7, 128, 128>}, {pipeline_mode = #tpu.pipeline_mode<synchronous>, transform_indices = @transform_2, window_bounds = array<i64: 32, 128>}, {pipeline_mode = #tpu.pipeline_mode<synchronous>, transform_indices = @transform_3, window_bounds = array<i64: 128, 128>}, {pipeline_mode = #tpu.pipeline_mode<synchronous>, transform_indices = @transform_4, window_bounds = array<i64: 8, 128>}]} {
    %c0 = arith.constant 0 : index
    %c0_0 = arith.constant 0 : index
    %0 = vector.load %arg1[%c0, %c0_0] : memref<32x7xi32, #tpu.memory_space<vmem>>, vector<32x7xi32>
    %1 = tpu.iota {dimensions = array<i32: 1>} : vector<32x128xi32>
    %cst = arith.constant 0.000000e+00 : f32
    %2 = vector.broadcast %cst : f32 to vector<32x128xf32>
    %3 = vector.extract_strided_slice %0 {offsets = [0, 0], sizes = [32, 1], strides = [1, 1]} : vector<32x7xi32> to vector<32x1xi32>
    %4 = vector.broadcast %3 : vector<32x1xi32> to vector<32x128xi32>
    %5 = arith.cmpi eq, %4, %1 : vector<32x128xi32>
    %cst_1 = arith.constant 1.000000e+00 : f32
    %cst_2 = arith.constant 0.000000e+00 : f32
    %6 = vector.broadcast %cst_1 : f32 to vector<32x128xf32>
    %7 = vector.broadcast %cst_2 : f32 to vector<32x128xf32>
    %8 = arith.select %5, %6, %7 : vector<32x128xi1>, vector<32x128xf32>
    %9 = arith.truncf %8 : vector<32x128xf32> to vector<32x128xbf16>
    %c0_3 = arith.constant 0 : index
    %c0_4 = arith.constant 0 : index
    %c0_5 = arith.constant 0 : index
    %10 = vector.load %arg2[%c0_3, %c0_4, %c0_5] : memref<7x128x128xbf16, #tpu.memory_space<vmem>>, vector<1x128x128xbf16>
    %11 = vector.shape_cast %10 : vector<1x128x128xbf16> to vector<128x128xbf16>
    %cst_6 = arith.constant dense<0.000000e+00> : vector<32x128xf32>
    %12 = tpu.matmul %9, %11, %cst_6 {dimension_numbers = #tpu.dot_dimension_numbers<[1], [0], [0], [1], [0, 0, 1, 1], [], []>} : vector<32x128xbf16>, vector<128x128xbf16>, vector<32x128xf32> -> vector<32x128xf32>
    %13 = arith.addf %2, %12 : vector<32x128xf32>
    %14 = vector.extract_strided_slice %0 {offsets = [0, 1], sizes = [32, 1], strides = [1, 1]} : vector<32x7xi32> to vector<32x1xi32>
    %15 = vector.broadcast %14 : vector<32x1xi32> to vector<32x128xi32>
    %16 = arith.cmpi eq, %15, %1 : vector<32x128xi32>
    %cst_7 = arith.constant 1.000000e+00 : f32
    %cst_8 = arith.constant 0.000000e+00 : f32
    %17 = vector.broadcast %cst_7 : f32 to vector<32x128xf32>
    %18 = vector.broadcast %cst_8 : f32 to vector<32x128xf32>
    %19 = arith.select %16, %17, %18 : vector<32x128xi1>, vector<32x128xf32>
    %20 = arith.truncf %19 : vector<32x128xf32> to vector<32x128xbf16>
    %c1 = arith.constant 1 : index
    %c0_9 = arith.constant 0 : index
    %c0_10 = arith.constant 0 : index
    %21 = vector.load %arg2[%c1, %c0_9, %c0_10] : memref<7x128x128xbf16, #tpu.memory_space<vmem>>, vector<1x128x128xbf16>
    %22 = vector.shape_cast %21 : vector<1x128x128xbf16> to vector<128x128xbf16>
    %cst_11 = arith.constant dense<0.000000e+00> : vector<32x128xf32>
    %23 = tpu.matmul %20, %22, %cst_11 {dimension_numbers = #tpu.dot_dimension_numbers<[1], [0], [0], [1], [0, 0, 1, 1], [], []>} : vector<32x128xbf16>, vector<128x128xbf16>, vector<32x128xf32> -> vector<32x128xf32>
    %24 = arith.addf %13, %23 : vector<32x128xf32>
    %25 = vector.extract_strided_slice %0 {offsets = [0, 2], sizes = [32, 1], strides = [1, 1]} : vector<32x7xi32> to vector<32x1xi32>
    %26 = vector.broadcast %25 : vector<32x1xi32> to vector<32x128xi32>
    %27 = arith.cmpi eq, %26, %1 : vector<32x128xi32>
    %cst_12 = arith.constant 1.000000e+00 : f32
    %cst_13 = arith.constant 0.000000e+00 : f32
    %28 = vector.broadcast %cst_12 : f32 to vector<32x128xf32>
    %29 = vector.broadcast %cst_13 : f32 to vector<32x128xf32>
    %30 = arith.select %27, %28, %29 : vector<32x128xi1>, vector<32x128xf32>
    %31 = arith.truncf %30 : vector<32x128xf32> to vector<32x128xbf16>
    %c2 = arith.constant 2 : index
    %c0_14 = arith.constant 0 : index
    %c0_15 = arith.constant 0 : index
    %32 = vector.load %arg2[%c2, %c0_14, %c0_15] : memref<7x128x128xbf16, #tpu.memory_space<vmem>>, vector<1x128x128xbf16>
    %33 = vector.shape_cast %32 : vector<1x128x128xbf16> to vector<128x128xbf16>
    %cst_16 = arith.constant dense<0.000000e+00> : vector<32x128xf32>
    %34 = tpu.matmul %31, %33, %cst_16 {dimension_numbers = #tpu.dot_dimension_numbers<[1], [0], [0], [1], [0, 0, 1, 1], [], []>} : vector<32x128xbf16>, vector<128x128xbf16>, vector<32x128xf32> -> vector<32x128xf32>
    %35 = arith.addf %24, %34 : vector<32x128xf32>
    %36 = vector.extract_strided_slice %0 {offsets = [0, 3], sizes = [32, 1], strides = [1, 1]} : vector<32x7xi32> to vector<32x1xi32>
    %37 = vector.broadcast %36 : vector<32x1xi32> to vector<32x128xi32>
    %38 = arith.cmpi eq, %37, %1 : vector<32x128xi32>
    %cst_17 = arith.constant 1.000000e+00 : f32
    %cst_18 = arith.constant 0.000000e+00 : f32
    %39 = vector.broadcast %cst_17 : f32 to vector<32x128xf32>
    %40 = vector.broadcast %cst_18 : f32 to vector<32x128xf32>
    %41 = arith.select %38, %39, %40 : vector<32x128xi1>, vector<32x128xf32>
    %42 = arith.truncf %41 : vector<32x128xf32> to vector<32x128xbf16>
    %c3 = arith.constant 3 : index
    %c0_19 = arith.constant 0 : index
    %c0_20 = arith.constant 0 : index
    %43 = vector.load %arg2[%c3, %c0_19, %c0_20] : memref<7x128x128xbf16, #tpu.memory_space<vmem>>, vector<1x128x128xbf16>
    %44 = vector.shape_cast %43 : vector<1x128x128xbf16> to vector<128x128xbf16>
    %cst_21 = arith.constant dense<0.000000e+00> : vector<32x128xf32>
    %45 = tpu.matmul %42, %44, %cst_21 {dimension_numbers = #tpu.dot_dimension_numbers<[1], [0], [0], [1], [0, 0, 1, 1], [], []>} : vector<32x128xbf16>, vector<128x128xbf16>, vector<32x128xf32> -> vector<32x128xf32>
    %46 = arith.addf %35, %45 : vector<32x128xf32>
    %47 = vector.extract_strided_slice %0 {offsets = [0, 4], sizes = [32, 1], strides = [1, 1]} : vector<32x7xi32> to vector<32x1xi32>
    %48 = vector.broadcast %47 : vector<32x1xi32> to vector<32x128xi32>
    %49 = arith.cmpi eq, %48, %1 : vector<32x128xi32>
    %cst_22 = arith.constant 1.000000e+00 : f32
    %cst_23 = arith.constant 0.000000e+00 : f32
    %50 = vector.broadcast %cst_22 : f32 to vector<32x128xf32>
    %51 = vector.broadcast %cst_23 : f32 to vector<32x128xf32>
    %52 = arith.select %49, %50, %51 : vector<32x128xi1>, vector<32x128xf32>
    %53 = arith.truncf %52 : vector<32x128xf32> to vector<32x128xbf16>
    %c4 = arith.constant 4 : index
    %c0_24 = arith.constant 0 : index
    %c0_25 = arith.constant 0 : index
    %54 = vector.load %arg2[%c4, %c0_24, %c0_25] : memref<7x128x128xbf16, #tpu.memory_space<vmem>>, vector<1x128x128xbf16>
    %55 = vector.shape_cast %54 : vector<1x128x128xbf16> to vector<128x128xbf16>
    %cst_26 = arith.constant dense<0.000000e+00> : vector<32x128xf32>
    %56 = tpu.matmul %53, %55, %cst_26 {dimension_numbers = #tpu.dot_dimension_numbers<[1], [0], [0], [1], [0, 0, 1, 1], [], []>} : vector<32x128xbf16>, vector<128x128xbf16>, vector<32x128xf32> -> vector<32x128xf32>
    %57 = arith.addf %46, %56 : vector<32x128xf32>
    %58 = vector.extract_strided_slice %0 {offsets = [0, 5], sizes = [32, 1], strides = [1, 1]} : vector<32x7xi32> to vector<32x1xi32>
    %59 = vector.broadcast %58 : vector<32x1xi32> to vector<32x128xi32>
    %60 = arith.cmpi eq, %59, %1 : vector<32x128xi32>
    %cst_27 = arith.constant 1.000000e+00 : f32
    %cst_28 = arith.constant 0.000000e+00 : f32
    %61 = vector.broadcast %cst_27 : f32 to vector<32x128xf32>
    %62 = vector.broadcast %cst_28 : f32 to vector<32x128xf32>
    %63 = arith.select %60, %61, %62 : vector<32x128xi1>, vector<32x128xf32>
    %64 = arith.truncf %63 : vector<32x128xf32> to vector<32x128xbf16>
    %c5 = arith.constant 5 : index
    %c0_29 = arith.constant 0 : index
    %c0_30 = arith.constant 0 : index
    %65 = vector.load %arg2[%c5, %c0_29, %c0_30] : memref<7x128x128xbf16, #tpu.memory_space<vmem>>, vector<1x128x128xbf16>
    %66 = vector.shape_cast %65 : vector<1x128x128xbf16> to vector<128x128xbf16>
    %cst_31 = arith.constant dense<0.000000e+00> : vector<32x128xf32>
    %67 = tpu.matmul %64, %66, %cst_31 {dimension_numbers = #tpu.dot_dimension_numbers<[1], [0], [0], [1], [0, 0, 1, 1], [], []>} : vector<32x128xbf16>, vector<128x128xbf16>, vector<32x128xf32> -> vector<32x128xf32>
    %68 = arith.addf %57, %67 : vector<32x128xf32>
    %69 = vector.extract_strided_slice %0 {offsets = [0, 6], sizes = [32, 1], strides = [1, 1]} : vector<32x7xi32> to vector<32x1xi32>
    %70 = vector.broadcast %69 : vector<32x1xi32> to vector<32x128xi32>
    %71 = arith.cmpi eq, %70, %1 : vector<32x128xi32>
    %cst_32 = arith.constant 1.000000e+00 : f32
    %cst_33 = arith.constant 0.000000e+00 : f32
    %72 = vector.broadcast %cst_32 : f32 to vector<32x128xf32>
    %73 = vector.broadcast %cst_33 : f32 to vector<32x128xf32>
    %74 = arith.select %71, %72, %73 : vector<32x128xi1>, vector<32x128xf32>
    %75 = arith.truncf %74 : vector<32x128xf32> to vector<32x128xbf16>
    %c6 = arith.constant 6 : index
    %c0_34 = arith.constant 0 : index
    %c0_35 = arith.constant 0 : index
    %76 = vector.load %arg2[%c6, %c0_34, %c0_35] : memref<7x128x128xbf16, #tpu.memory_space<vmem>>, vector<1x128x128xbf16>
    %77 = vector.shape_cast %76 : vector<1x128x128xbf16> to vector<128x128xbf16>
    %cst_36 = arith.constant dense<0.000000e+00> : vector<32x128xf32>
    %78 = tpu.matmul %75, %77, %cst_36 {dimension_numbers = #tpu.dot_dimension_numbers<[1], [0], [0], [1], [0, 0, 1, 1], [], []>} : vector<32x128xbf16>, vector<128x128xbf16>, vector<32x128xf32> -> vector<32x128xf32>
    %79 = arith.addf %68, %78 : vector<32x128xf32>
    %cst_37 = arith.constant 0.000000e+00 : f32
    %80 = vector.broadcast %cst_37 : f32 to vector<32x128xf32>
    %81 = arith.maximumf %79, %80 : vector<32x128xf32>
    %c0_38 = arith.constant 0 : index
    %c0_39 = arith.constant 0 : index
    %82 = vector.load %arg3[%c0_38, %c0_39] : memref<32x128xf32, #tpu.memory_space<vmem>>, vector<32x128xf32>
    %83 = arith.mulf %81, %82 : vector<32x128xf32>
    %84 = vector.extract_strided_slice %83 {offsets = [0, 0], sizes = [16, 128], strides = [1, 1]} : vector<32x128xf32> to vector<16x128xf32>
    %cst_40 = arith.constant dense<0xFF800000> : vector<128xf32>
    %85 = vector.multi_reduction <maximumf>, %84, %cst_40 [0] : vector<16x128xf32> to vector<128xf32>
    %86 = vector.shape_cast %85 : vector<128xf32> to vector<1x128xf32>
    %87 = vector.extract_strided_slice %83 {offsets = [16, 0], sizes = [16, 128], strides = [1, 1]} : vector<32x128xf32> to vector<16x128xf32>
    %cst_41 = arith.constant dense<0xFF800000> : vector<128xf32>
    %88 = vector.multi_reduction <maximumf>, %87, %cst_41 [0] : vector<16x128xf32> to vector<128xf32>
    %89 = vector.shape_cast %88 : vector<128xf32> to vector<1x128xf32>
    %cst_42 = arith.constant 0.000000e+00 : f32
    %90 = vector.broadcast %cst_42 : f32 to vector<6x128xf32>
    %91 = tpu.concatenate %86, %89, %90 in 0 : vector<1x128xf32>, vector<1x128xf32>, vector<6x128xf32> -> vector<8x128xf32>
    %92 = arith.truncf %91 : vector<8x128xf32> to vector<8x128xbf16>
    %c0_43 = arith.constant 0 : index
    %c0_44 = arith.constant 0 : index
    %93 = vector.load %arg4[%c0_43, %c0_44] : memref<128x128xbf16, #tpu.memory_space<vmem>>, vector<128x128xbf16>
    %cst_45 = arith.constant dense<0.000000e+00> : vector<8x128xf32>
    %94 = tpu.matmul %92, %93, %cst_45 {dimension_numbers = #tpu.dot_dimension_numbers<[1], [0], [0], [1], [0, 0, 1, 1], [], []>} : vector<8x128xbf16>, vector<128x128xbf16>, vector<8x128xf32> -> vector<8x128xf32>
    %c0_46 = arith.constant 0 : index
    %c0_47 = arith.constant 0 : index
    %95 = vector.load %arg5[%c0_46, %c0_47] : memref<8x128xf32, #tpu.memory_space<vmem>>, vector<8x128xf32>
    tpu.vector_store %arg5[%c0_46, %c0_47], %94 {strides = array<i32>} : memref<8x128xf32, #tpu.memory_space<vmem>>, vector<8x128xf32>,
    return
  }
  func.func @transform_0(%arg0: i32) -> (i32, i32) {
    %c0_i32 = arith.constant 0 : i32
    %c0_i32_0 = arith.constant 0 : i32
    %c0_i32_1 = arith.constant 0 : i32
    return %c0_i32, %c0_i32_0 : i32, i32
  }
  func.func @transform_1(%arg0: i32) -> (i32, i32, i32) {
    %c0_i32 = arith.constant 0 : i32
    %c0_i32_0 = arith.constant 0 : i32
    %c0_i32_1 = arith.constant 0 : i32
    %c0_i32_2 = arith.constant 0 : i32
    return %c0_i32, %c0_i32_0, %c0_i32_1 : i32, i32, i32
  }
  func.func @transform_2(%arg0: i32) -> (i32, i32) {
    %c0_i32 = arith.constant 0 : i32
    %c0_i32_0 = arith.constant 0 : i32
    %c0_i32_1 = arith.constant 0 : i32
    return %c0_i32, %c0_i32_0 : i32, i32
  }
  func.func @transform_3(%arg0: i32) -> (i32, i32) {
    %c0_i32 = arith.constant 0 : i32
    %c0_i32_0 = arith.constant 0 : i32
    %c0_i32_1 = arith.constant 0 : i32
    return %c0_i32, %c0_i32_0 : i32, i32
  }
  func.func @transform_4(%arg0: i32) -> (i32, i32) {
    %c0_i32 = arith.constant 0 : i32
    %c0_i32_0 = arith.constant 0 : i32
    %c0_i32_1 = arith.constant 0 : i32
    return %c0_i32, %c0_i32_0 : i32, i32
  }
}

</mosaic_0001>

<bundles_post_ra>
// kernel: _forward.1
= control target key start
LH: loop header
LB: loop body
LE: loop exit
PB: predicated region body
PF: predicated region fallthrough
CT: control target
= control target key end

     0   :  { %9 = vsyncpa [#allocation3], 0  ;;  %s1327_s18 = smov [#allocation2]   ;;  %s1328_s20 = smov 64   ;;  %s1483_s0 = inlined_call_operand.vmem [shape: s32[32,7], index: 0, kind: input, shape index: {}]   ;;  %s1484_s1 = inlined_call_operand.hbm [shape: bf16[7,128,128], index: 1, kind: input, shape index: {}]   ;;  %s1485_s2 = inlined_call_operand.vmem [shape: f32[32,128], index: 2, kind: input, shape index: {}]   ;;  %s1486_s3 = inlined_call_operand.vmem [shape: bf16[128,128], index: 3, kind: input, shape index: {}]   ;;  %s1487_s4 = inlined_call_operand.vmem [shape: f32[8,128], index: 4, kind: output, shape index: {}]  }
   0x1   :  { %s16_s17 = sshll.u32 %s1484_s1, 4  ;;  %s18_s19 = sshll.u32 %s1327_s18, 4  ;;  %s17_s17 = int_to_ptr.hbm [resolvable:$true] %s16_s17  ;;  %s19_s19 = int_to_ptr.vmem [resolvable:$true] %s18_s19 }
   0x2   :  { %s1329_s21 = smov 4  }
   0x3   :  { %24 = dma.hbm_to_vmem [thread:$0]  %s17_s17, 7168, %s19_s19, [#allocation3], %s1328_s20, %s1328_s20, %s1329_s21  }
   0x4   :  { %1325 = dma.done.wait [#allocation3], 7168  }
   0x5   :  { %1326 = vsyncadd [#allocation3], 4294960128  ;;  %v1330_v0 = vmov 2   ;;  %v1331_v1 = vmov 1   ;;  %v1332_v2 = vmov 0   ;;  %v33_v3 = vld [vmem:[%s1483_s0] sm:$0xff]  ;;  %v37_v36 = vlaneseq }
   0x6   :  { %1276 = vset.pattern.permute.xlu0 %v1330_v0  ;;  %1277 = vset.pattern.permute.xlu1 %v1331_v1  ;;  %v34_v4 = vld [vmem:[%s1483_s0 + $0x8] sm:$0xff]  ;;  %v1375_v5 = vld [vmem:[%s1483_s0 + $0x10] sm:$0xff]  ;;  %v1380_v6 = vld [vmem:[%s1483_s0 + $0x18] sm:$0xff]  ;;  %v1333_v7 = vmov 6   ;;  %v1334_v8 = vmov 3   ;;  %v1335_v9 = vmov 5  }
   0x7   :  { %1278 = vset.pattern.permute.xlu2 %v1332_v2  ;;  %78 = vperm.xlu1 %1277, %v33_v3   ;;  %v1336_v10 = vmov 4   ;;  %v1208_v11 = vld [vmem:[#allocation2 + $0x38] sm:$0xff]  ;;  %v1207_v12 = vld [vmem:[#allocation2 + $0x30] sm:$0xff]  ;;  %v1206_v15 = vld [vmem:[#allocation2 + $0x28] sm:$0xff]  ;;  %v1400_v39 = vand.u32 127, %v37_v36 }
   0x8   :  { %251 = vperm.xlu0 %1276, %v33_v3   ;;  %40 = vperm.xlu2 %1278, %v33_v3   ;;  %v1216_v13 = vld [vmem:[#allocation2 + $0x78] sm:$0xff]  ;;  %v1215_v16 = vld [vmem:[#allocation2 + $0x70] sm:$0xff]  ;;  %v1205_v18 = vld [vmem:[#allocation2 + $0x20] sm:$0xff]  ;;  %v1337_v45 = vmov 1.0|1.0  }
   0x9   :  { %231 = vmatpush.bf16.msra.mxu1 %v1208_v11  ;;  %v1224_v14 = vld [vmem:[#allocation2 + $0xb8] sm:$0xff]  ;;  %164 = vmatpush.bf16.msra.mxu0 %v1216_v13  ;;  %v1223_v17 = vld [vmem:[#allocation2 + $0xb0] sm:$0xff]  ;;  %v1214_v19 = vld [vmem:[#allocation2 + $0x68] sm:$0xff] }
   0xa   :  { %337 = vmatpush.bf16.msra.mxu2 %v1224_v14  ;;  %v1222_v20 = vld [vmem:[#allocation2 + $0xa8] sm:$0xff]  ;;  %v1204_v21 = vld [vmem:[#allocation2 + $0x18] sm:$0xff]  ;;  %v1213_v22 = vld [vmem:[#allocation2 + $0x60] sm:$0xff] }
   0xb   :  { %v1221_v23 = vld [vmem:[#allocation2 + $0xa0] sm:$0xff]  ;;  %v1203_v24 = vld [vmem:[#allocation2 + $0x10] sm:$0xff]  ;;  %v1212_v25 = vld [vmem:[#allocation2 + $0x58] sm:$0xff] }
   0xc   :  { %v1220_v26 = vld [vmem:[#allocation2 + $0x98] sm:$0xff]  ;;  %v1202_v27 = vld [vmem:[#allocation2 + $0x8] sm:$0xff]  ;;  %v1211_v28 = vld [vmem:[#allocation2 + $0x50] sm:$0xff] }
   0xd   :  { %232 = vmatpush.bf16.msra.mxu1 %v1207_v12  ;;  %165 = vmatpush.bf16.msra.mxu0 %v1215_v16  ;;  %v1219_v29 = vld [vmem:[#allocation2 + $0x90] sm:$0xff]  ;;  %v1201_v30 = vld [vmem:[#allocation2] sm:$0xff]  ;;  %v1210_v31 = vld [vmem:[#allocation2 + $0x48] sm:$0xff] }
   0xe   :  { %338 = vmatpush.bf16.msra.mxu2 %v1223_v17  ;;  %v1218_v32 = vld [vmem:[#allocation2 + $0x88] sm:$0xff]  ;;  %v1232_v33 = vld [vmem:[#allocation2 + $0xf8] sm:$0xff]  ;;  %v1209_v34 = vld [vmem:[#allocation2 + $0x40] sm:$0xff] }
   0xf   :  { %81 = vperm.xlu1 %1277, %v34_v4   ;;  %447 = vmatpush.bf16.msra.mxu3 %v1232_v33  ;;  %v1217_v35 = vld [vmem:[#allocation2 + $0x80] sm:$0xff]  ;;  %v1231_v38 = vld [vmem:[#allocation2 + $0xf0] sm:$0xff]  ;;  %v1230_v40 = vld [vmem:[#allocation2 + $0xe8] sm:$0xff] }
  0x10   :  { %254 = vperm.xlu0 %1276, %v34_v4   ;;  %43 = vperm.xlu2 %1278, %v34_v4   ;;  %v1256_v41 = vld [vmem:[#allocation2 + $0x1b8] sm:$0xff]  ;;  %v1229_v43 = vld [vmem:[#allocation2 + $0xe0] sm:$0xff]  ;;  %v1255_v44 = vld [vmem:[#allocation2 + $0x1b0] sm:$0xff] }
  0x11   :  { %233 = vmatpush.bf16.msra.mxu1 %v1206_v15  ;;  %166 = vmatpush.bf16.msra.mxu0 %v1214_v19  ;;  %v1228_v46 = vld [vmem:[#allocation2 + $0xd8] sm:$0xff]  ;;  %v1254_v48 = vld [vmem:[#allocation2 + $0x1a8] sm:$0xff]  ;;  %v1227_v50 = vld [vmem:[#allocation2 + $0xd0] sm:$0xff] }
  0x12   :  { %339 = vmatpush.bf16.msra.mxu2 %v1222_v20  ;;  %v1240_v47 = vld [vmem:[#allocation2 + $0x138] sm:$0xff]  ;;  %v1253_v51 = vld [vmem:[#allocation2 + $0x1a0] sm:$0xff]  ;;  %v1239_v52 = vld [vmem:[#allocation2 + $0x130] sm:$0xff] }
  0x13   :  { %448 = vmatpush.bf16.msra.mxu3 %v1231_v38  ;;  %v1248_v49 = vld [vmem:[#allocation2 + $0x178] sm:$0xff]  ;;  %v1247_v53 = vld [vmem:[#allocation2 + $0x170] sm:$0xff]  ;;  %v1226_v54 = vld [vmem:[#allocation2 + $0xc8] sm:$0xff] }
  0x14   :  { %v1252_v55 = vld [vmem:[#allocation2 + $0x198] sm:$0xff]  ;;  %v1238_v56 = vld [vmem:[#allocation2 + $0x128] sm:$0xff]  ;;  %v1225_v60 = vld [vmem:[#allocation2 + $0xc0] sm:$0xff] }
  0x15   :  { %234 = vmatpush.bf16.msra.mxu1 %v1205_v18  ;;  %167 = vmatpush.bf16.msra.mxu0 %v1213_v22  ;;  %v1246_v57 = vld [vmem:[#allocation2 + $0x168] sm:$0xff]  ;;  %v1251_v62 = vld [vmem:[#allocation2 + $0x190] sm:$0xff]  ;;  %v1237_v63 = vld [vmem:[#allocation2 + $0x120] sm:$0xff] }
  0x16   :  { %340 = vmatpush.bf16.msra.mxu2 %v1221_v23  ;;  %v1242_v11 = vld [vmem:[#allocation2 + $0x148] sm:$0xff]  ;;  %v1233_v14 = vld [vmem:[#allocation2 + $0x100] sm:$0xff] }
  0x17   :  { %1279 = vset.pattern.permute.xlu1 %v1330_v0  ;;  %449 = vmatpush.bf16.msra.mxu3 %v1230_v40  ;;  %v1245_v0 = vld [vmem:[#allocation2 + $0x160] sm:$0xff] }
  0x18   :  { %257 = vperm.xlu0 %1276, %v1375_v5   ;;  %260 = vperm.xlu1 %1279, %v1380_v6   ;;  %v1241_v16 = vld [vmem:[#allocation2 + $0x140] sm:$0xff] }
  0x19   :  { %1280 = vset.pattern.permute.xlu2 %v1331_v1  ;;  %235 = vmatpush.bf16.msra.mxu1 %v1204_v21 }
  0x1a   :  { %84 = vperm.xlu2 %1280, %v1375_v5   ;;  %168 = vmatpush.bf16.msra.mxu0 %v1212_v25 }
  0x1b   :  { %341 = vmatpush.bf16.msra.mxu2 %v1220_v26  ;;  %450 = vmatpush.bf16.msra.mxu3 %v1229_v43 }
  0x1d   :  { %236 = vmatpush.bf16.msra.mxu1 %v1203_v24 }
  0x1e   :  { %169 = vmatpush.bf16.msra.mxu0 %v1211_v28 }
  0x1f   :  { %342 = vmatpush.bf16.msra.mxu2 %v1219_v29  ;;  %451 = vmatpush.bf16.msra.mxu3 %v1228_v46 }
  0x20   :  { %1281 = vset.pattern.permute.xlu0 %v1331_v1  ;;  %1282 = vset.pattern.permute.xlu1 %v1332_v2  ;;  %v1250_v1 = vld [vmem:[#allocation2 + $0x188] sm:$0xff] }
  0x21   :  { %87 = vperm.xlu0 %1281, %v1380_v6   ;;  %46 = vperm.xlu1 %1282, %v1375_v5  }
  0x22   :  { %1283 = vset.pattern.permute.xlu2 %v1332_v2  ;;  %237 = vmatpush.bf16.msra.mxu1 %v1202_v27  ;;  %v1236_v2 = vld [vmem:[#allocation2 + $0x118] sm:$0xff] }
  0x23   :  { %49 = vperm.xlu2 %1283, %v1380_v6   ;;  %170 = vmatpush.bf16.msra.mxu0 %v1210_v31 }
  0x24   :  { %343 = vmatpush.bf16.msra.mxu2 %v1218_v32  ;;  %452 = vmatpush.bf16.msra.mxu3 %v1227_v50 }
  0x26   :  { %238 = vmatpush.bf16.msra.mxu1 %v1201_v30 }
  0x27   :  { %171 = vmatpush.bf16.msra.mxu0 %v1209_v34 }
  0x28   :  { %344 = vmatpush.bf16.msra.mxu2 %v1217_v35  ;;  %453 = vmatpush.bf16.msra.mxu3 %v1226_v54 }
  0x29   :  { %1286 = vset.pattern.permute.xlu0 %v1333_v7  ;;  %1284 = vset.pattern.permute.xlu1 %v1334_v8 }
  0x2a   :  { %691 = vperm.xlu0 %1286, %v33_v3   ;;  %361 = vperm.xlu1 %1284, %v33_v3  }
  0x2b   :  { %1285 = vset.pattern.permute.xlu2 %v1334_v8  ;;  %557 = vmatpush.bf16.msrb.mxu0 %v1240_v47 }
  0x2c   :  { %364 = vperm.xlu2 %1285, %v34_v4   ;;  %777 = vmatpush.bf16.msrb.mxu2 %v1256_v41 }
  0x2d   :  { %667 = vmatpush.bf16.msrb.mxu1 %v1248_v49  ;;  %454 = vmatpush.bf16.msra.mxu3 %v1225_v60 }
  0x2f   :  { %558 = vmatpush.bf16.msrb.mxu0 %v1239_v52 }
  0x30   :  { %778 = vmatpush.bf16.msrb.mxu2 %v1255_v44 }
  0x31   :  { %668 = vmatpush.bf16.msrb.mxu1 %v1247_v53 }
  0x32   :  { %1291 = vset.pattern.permute.xlu0 %v1335_v9  ;;  %1287 = vset.pattern.permute.xlu1 %v1333_v7 }
  0x33   :  { %584 = vperm.xlu0 %1291, %v34_v4   ;;  %694 = vperm.xlu1 %1287, %v34_v4  }
  0x34   :  { %1288 = vset.pattern.permute.xlu2 %v1336_v10  ;;  %779 = vmatpush.bf16.msrb.mxu2 %v1254_v48  ;;  %v1264_v48 = vld [vmem:[%s1486_s3 + $0x38] sm:$0xff] }
  0x35   :  { %471 = vperm.xlu2 %1288, %v33_v3   ;;  %559 = vmatpush.bf16.msrb.mxu0 %v1238_v56 }
  0x36   :  { %669 = vmatpush.bf16.msrb.mxu1 %v1246_v57  ;;  %895 = vmatpush.bf16.msrb.mxu3 %v1264_v48 }
  0x38   :  { %780 = vmatpush.bf16.msrb.mxu2 %v1253_v51  ;;  %v1262_v51 = vld [vmem:[%s1486_s3 + $0x28] sm:$0xff] }
  0x39   :  { %560 = vmatpush.bf16.msrb.mxu0 %v1237_v63 }
  0x3a   :  { %670 = vmatpush.bf16.msrb.mxu1 %v1245_v0  ;;  %v1260_v0 = vld [vmem:[%s1486_s3 + $0x18] sm:$0xff] }
  0x3b   :  { %1296 = vset.pattern.permute.xlu0 %v1336_v10  ;;  %1289 = vset.pattern.permute.xlu1 %v1336_v10 }
  0x3c   :  { %477 = vperm.xlu0 %1296, %v1375_v5   ;;  %474 = vperm.xlu1 %1289, %v34_v4  }
  0x3d   :  { %1290 = vset.pattern.permute.xlu2 %v1335_v9  ;;  %781 = vmatpush.bf16.msrb.mxu2 %v1252_v55 }
  0x3e   :  { %581 = vperm.xlu2 %1290, %v33_v3   ;;  %v1244_v3 = vld [vmem:[#allocation2 + $0x158] sm:$0xff]  ;;  %561 = vmatpush.bf16.msrb.mxu0 %v1236_v2 }
  0x3f   :  { %671 = vmatpush.bf16.msrb.mxu1 %v1244_v3  ;;  %v1259_v3 = vld [vmem:[%s1486_s3 + $0x10] sm:$0xff] }
  0x41   :  { %782 = vmatpush.bf16.msrb.mxu2 %v1251_v62 }
  0x44   :  { %1300 = vset.pattern.permute.xlu0 %v1333_v7  ;;  %1292 = vset.pattern.permute.xlu1 %v1334_v8 }
  0x45   :  { %367 = vperm.xlu1 %1292, %v1375_v5   ;;  %783 = vmatpush.bf16.msrb.mxu2 %v1250_v1 }
  0x46   :  { %1293 = vset.pattern.permute.xlu2 %v1334_v8  ;;  %v1235_v8 = vld [vmem:[#allocation2 + $0x110] sm:$0xff] }
  0x47   :  { %370 = vperm.xlu2 %1293, %v1380_v6   ;;  %562 = vmatpush.bf16.msrb.mxu0 %v1235_v8 }
  0x4d   :  { %1294 = vset.pattern.permute.xlu1 %v1333_v7 }
  0x4e   :  { %697 = vperm.xlu1 %1294, %v1375_v5  }
  0x4f   :  { %1295 = vset.pattern.permute.xlu2 %v1333_v7 }
  0x50   :  { %700 = vperm.xlu2 %1295, %v1380_v6  }
  0x56   :  { %1297 = vset.pattern.permute.xlu1 %v1336_v10  ;;  %v1234_v10 = vld [vmem:[#allocation2 + $0x108] sm:$0xff] }
  0x57   :  { %480 = vperm.xlu1 %1297, %v1380_v6   ;;  %563 = vmatpush.bf16.msrb.mxu0 %v1234_v10 }
  0x58   :  { %1298 = vset.pattern.permute.xlu2 %v1335_v9 }
  0x59   :  { %587 = vperm.xlu2 %1298, %v1375_v5  }
  0x5b   :  { %564 = vmatpush.bf16.msrb.mxu0 %v1233_v14 }
  0x5f   :  { %1299 = vset.pattern.permute.xlu1 %v1335_v9  ;;  %v1243_v9 = vld [vmem:[#allocation2 + $0x150] sm:$0xff] }
  0x60   :  { %590 = vperm.xlu1 %1299, %v1380_v6   ;;  %v1249_v6 = vld [vmem:[#allocation2 + $0x180] sm:$0xff]  ;;  %672 = vmatpush.bf16.msrb.mxu1 %v1243_v9  ;;  %v1258_v9 = vld [vmem:[%s1486_s3 + $0x8] sm:$0xff] }
  0x61   :  { %784 = vmatpush.bf16.msrb.mxu2 %v1249_v6 }
  0x62   :  { %v41_v37 = vpop.permute.xlu2 %40 }
  0x63   :  { %vm51_vm0 = vcmp.eq.s32.totalorder %v41_v37, %v1400_v39 }
  0x64   :  { %673 = vmatpush.bf16.msrb.mxu1 %v1242_v11 }
  0x68   :  { %674 = vmatpush.bf16.msrb.mxu1 %v1241_v16 }
  0x6a   :  { %v44_v42 = vpop.permute.xlu2 %43 }
  0x6b   :  { %vm52_vm1 = vcmp.eq.s32.totalorder %v44_v42, %v1400_v39 }
  0x6c   :  { %vm982_vm2 = vmpackc.low %vm52_vm1, %vm51_vm0 }
  0x6d   :  { %983 = vmatmul.msk.bf16.vlgmr.msra.gmra.mxu1 %vm982_vm2, %v1337_v45 }
  0x74   :  { %v85_v61 = vpop.permute.xlu2 %84 }
  0x75   :  { %vm91_vm11 = vcmp.eq.s32.totalorder %v85_v61, %v1400_v39 }
  0x79   :  { %v79_v58 = vpop.permute.xlu1 %78 }
  0x7a   :  { %v252_v59 = vpop.permute.xlu0 %251  ;;  %vm89_vm4 = vcmp.eq.s32.totalorder %v79_v58, %v1400_v39  ;;  %v1261_v58 = vld [vmem:[%s1486_s3 + $0x20] sm:$0xff] }
  0x7b   :  { %vm262_vm3 = vcmp.eq.s32.totalorder %v252_v59, %v1400_v39 }
  0x7d   :  { %v50_v7 = vpop.permute.xlu2 %49 }
  0x7e   :  { %vm54_vm12 = vcmp.eq.s32.totalorder %v50_v7, %v1400_v39 }
  0x81   :  { %v82_v4 = vpop.permute.xlu1 %81 }
  0x82   :  { %v255_v5 = vpop.permute.xlu0 %254  ;;  %vm90_vm5 = vcmp.eq.s32.totalorder %v82_v4, %v1400_v39 }
  0x83   :  { %vm263_vm6 = vcmp.eq.s32.totalorder %v255_v5, %v1400_v39  ;;  %vm946_vm7 = vmpackc.low %vm90_vm5, %vm89_vm4 }
  0x84   :  { %vm1018_vm8 = vmpackc.low %vm263_vm6, %vm262_vm3  ;;  %947 = vmatmul.msk.bf16.vlgmr.msra.gmra.mxu0 %vm946_vm7, %v1337_v45 }
  0x85   :  { %1019 = vmatmul.msk.bf16.vlgmr.msra.gmra.mxu2 %vm1018_vm8, %v1337_v45 }
  0x86   :  { %v365_v15 = vpop.permute.xlu2 %364 }
  0x87   :  { %vm373_vm2 = vcmp.eq.s32.totalorder %v365_v15, %v1400_v39  ;;  %v805_v15 = vld [vmem:[%s1485_s2 + $0x8] sm:$0xff] }
  0x8a   :  { %v258_v12 = vpop.permute.xlu0 %257  ;;  %v261_v13 = vpop.permute.xlu1 %260 }
  0x8b   :  { %vm265_vm9 = vcmp.eq.s32.totalorder %v261_v13, %v1400_v39  ;;  %vm264_vm10 = vcmp.eq.s32.totalorder %v258_v12, %v1400_v39  ;;  %v1257_v12 = vld [vmem:[%s1486_s3] sm:$0xff] }
  0x8c   :  { %vm1020_vm13 = vmpackc.low %vm265_vm9, %vm264_vm10 }
  0x8f   :  { %v472_v19 = vpop.permute.xlu2 %471 }
  0x93   :  { %v88_v17 = vpop.permute.xlu0 %87  ;;  %v47_v18 = vpop.permute.xlu1 %46 }
  0x94   :  { %vm92_vm14 = vcmp.eq.s32.totalorder %v88_v17, %v1400_v39  ;;  %vm53_vm0 = vcmp.eq.s32.totalorder %v47_v18, %v1400_v39  ;;  %v804_v18 = vld [vmem:[%s1485_s2] sm:$0xff] }
  0x95   :  { %vm948_vm15 = vmpackc.low %vm92_vm14, %vm91_vm11  ;;  %1021 = vmatmul.msk.bf16.gmra.mxu2 %vm1020_vm13, %v1337_v45  ;;  %vm482_vm11 = vcmp.eq.s32.totalorder %v472_v19, %v1400_v39 }
  0x96   :  { %vm984_vm1 = vmpackc.low %vm54_vm12, %vm53_vm0  ;;  %949 = vmatmul.msk.bf16.gmra.mxu0 %vm948_vm15, %v1337_v45 }
  0x97   :  { %985 = vmatmul.msk.bf16.gmra.mxu1 %vm984_vm1, %v1337_v45 }
  0x98   :  { %v582_v22 = vpop.permute.xlu2 %581 }
  0x99   :  { %vm592_vm5 = vcmp.eq.s32.totalorder %v582_v22, %v1400_v39 }
  0x9c   :  { %v362_v20 = vpop.permute.xlu1 %361  ;;  %v692_v21 = vpop.permute.xlu0 %691 }
  0x9d   :  { %vm372_vm3 = vcmp.eq.s32.totalorder %v362_v20, %v1400_v39  ;;  %vm702_vm6 = vcmp.eq.s32.totalorder %v692_v21, %v1400_v39 }
  0x9e   :  { %vm1054_vm4 = vmpackc.low %vm373_vm2, %vm372_vm3 }
  0x9f   :  { %1055 = vmatmul.msk.bf16.vlgmr.msra.gmra.mxu3 %vm1054_vm4, %v1337_v45 }
  0xa1   :  { %v371_v26 = vpop.permute.xlu2 %370 }
  0xa2   :  { %vm375_vm14 = vcmp.eq.s32.totalorder %v371_v26, %v1400_v39 }
  0xa5   :  { %v585_v23 = vpop.permute.xlu0 %584  ;;  %v695_v24 = vpop.permute.xlu1 %694 }
  0xa6   :  { %vm593_vm7 = vcmp.eq.s32.totalorder %v585_v23, %v1400_v39  ;;  %vm703_vm8 = vcmp.eq.s32.totalorder %v695_v24, %v1400_v39 }
  0xa7   :  { %vm1126_vm9 = vmpackc.low %vm593_vm7, %vm592_vm5 }
  0xa8   :  { %vm1162_vm10 = vmpackc.low %vm703_vm8, %vm702_vm6  ;;  %1127 = vmatmul.msk.bf16.vlgmr.msrb.gmra.mxu1 %vm1126_vm9, %v1337_v45 }
  0xa9   :  { %1163 = vmatmul.msk.bf16.vlgmr.msrb.gmra.mxu2 %vm1162_vm10, %v1337_v45  ;;  %vm826_vm10 = vcmask 1040384  }
  0xaa   :  { %v701_v28 = vpop.permute.xlu2 %700 }
  0xab   :  { %vm705_vm1 = vcmp.eq.s32.totalorder %v701_v28, %v1400_v39 }
  0xae   :  { %v475_v25 = vpop.permute.xlu1 %474  ;;  %v478_v30 = vpop.permute.xlu0 %477 }
  0xaf   :  { %vm483_vm12 = vcmp.eq.s32.totalorder %v475_v25, %v1400_v39  ;;  %vm484_vm4 = vcmp.eq.s32.totalorder %v478_v30, %v1400_v39 }
  0xb0   :  { %vm1090_vm13 = vmpackc.low %vm483_vm12, %vm482_vm11  ;;  %vm828_vm11 = vcmask 1041408  }
  0xb1   :  { %1091 = vmatmul.msk.bf16.vlgmr.msrb.gmra.mxu0 %vm1090_vm13, %v1337_v45  ;;  %vm1198_vm12 = vmpackc.low %vm828_vm11, %vm828_vm11 }
  0xb3   :  { %v588_v32 = vpop.permute.xlu2 %587 }
  0xb4   :  { %vm594_vm7 = vcmp.eq.s32.totalorder %v588_v32, %v1400_v39 }
  0xb7   :  { %v368_v27 = vpop.permute.xlu1 %367 }
  0xb8   :  { %vm374_vm15 = vcmp.eq.s32.totalorder %v368_v27, %v1400_v39 }
  0xb9   :  { %vm1056_vm0 = vmpackc.low %vm375_vm14, %vm374_vm15 }
  0xba   :  { %1057 = vmatmul.msk.bf16.gmra.mxu3 %vm1056_vm0, %v1337_v45 }
  0xc0   :  { %v698_v29 = vpop.permute.xlu1 %697 }
  0xc1   :  { %vm704_vm2 = vcmp.eq.s32.totalorder %v698_v29, %v1400_v39 }
  0xc2   :  { %vm1164_vm3 = vmpackc.low %vm705_vm1, %vm704_vm2 }
  0xc3   :  { %1165 = vmatmul.msk.bf16.gmra.mxu2 %vm1164_vm3, %v1337_v45 }
  0xc9   :  { %v481_v31 = vpop.permute.xlu1 %480 }
  0xca   :  { %vm485_vm5 = vcmp.eq.s32.totalorder %v481_v31, %v1400_v39 }
  0xcb   :  { %vm1092_vm6 = vmpackc.low %vm485_vm5, %vm484_vm4 }
  0xcc   :  { %1093 = vmatmul.msk.bf16.gmra.mxu0 %vm1092_vm6, %v1337_v45 }
  0xd2   :  { %v591_v33 = vpop.permute.xlu1 %590 }
  0xd3   :  { %vm595_vm8 = vcmp.eq.s32.totalorder %v591_v33, %v1400_v39 }
  0xd4   :  { %vm1128_vm9 = vmpackc.low %vm595_vm8, %vm594_vm7 }
  0xd5   :  { %1129 = vmatmul.msk.bf16.gmra.mxu1 %vm1128_vm9, %v1337_v45  ;;  %v1263_v45 = vld [vmem:[%s1486_s3 + $0x30] sm:$0xff] }
  0xd6   :  { %896 = vmatpush.bf16.msrb.mxu3 %v1263_v45 }
  0xda   :  { %897 = vmatpush.bf16.msrb.mxu3 %v1262_v51 }
  0xde   :  { %898 = vmatpush.bf16.msrb.mxu3 %v1261_v58 }
  0xe2   :  { %899 = vmatpush.bf16.msrb.mxu3 %v1260_v0 }
  0xe6   :  { %900 = vmatpush.bf16.msrb.mxu3 %v1259_v3 }
  0xea   :  { %v240_v35 = vpop.f32.mrf.mxu1  ;;  %901 = vmatpush.bf16.msrb.mxu3 %v1258_v9 }
  0xee   :  { %902 = vmatpush.bf16.msrb.mxu3 %v1257_v12 }
  0xf2   :  { %v242_v38 = vpop.f32.mrf.mxu1 }
 0x101   :  { %v173_v34 = vpop.f32.mrf.mxu0 }
 0x102   :  { %v241_v54 = vadd.f32 %v240_v35, %v173_v34 }
 0x108   :  { %v346_v36 = vpop.f32.mrf.mxu2 }
 0x109   :  { %v175_v37 = vpop.f32.mrf.mxu0  ;;  %v356_v59 = vadd.f32 %v346_v36, %v241_v54 }
 0x10a   :  { %v243_v52 = vadd.f32 %v242_v38, %v175_v37 }
 0x110   :  { %v348_v40 = vpop.f32.mrf.mxu2 }
 0x111   :  { %v357_v55 = vadd.f32 %v348_v40, %v243_v52  ;;  %v806_v40 = vld [vmem:[%s1485_s2 + $0x10] sm:$0xff] }
 0x113   :  { %v178_v41 = vpop.f32.mrf.mxu0 }
 0x114   :  { %v245_v42 = vpop.f32.mrf.mxu1 }
 0x115   :  { %v246_v10 = vadd.f32 %v245_v42, %v178_v41  ;;  %v807_v41 = vld [vmem:[%s1485_s2 + $0x18] sm:$0xff] }
 0x118   :  { %v351_v43 = vpop.f32.mrf.mxu2 }
 0x119   :  { %v358_v13 = vadd.f32 %v351_v43, %v246_v10 }
 0x11b   :  { %v180_v44 = vpop.f32.mrf.mxu0 }
 0x11c   :  { %v247_v46 = vpop.f32.mrf.mxu1 }
 0x11d   :  { %v248_v21 = vadd.f32 %v247_v46, %v180_v44 }
 0x120   :  { %v353_v49 = vpop.f32.mrf.mxu2 }
 0x121   :  { %v359_v25 = vadd.f32 %v353_v49, %v248_v21 }
 0x122   :  { %v456_v47 = vpop.f32.mrf.mxu3 }
 0x123   :  { %v466_v61 = vadd.f32 %v456_v47, %v356_v59 }
 0x125   :  { %v676_v50 = vpop.f32.mrf.mxu1 }
 0x12a   :  { %v458_v53 = vpop.f32.mrf.mxu3 }
 0x12b   :  { %v467_v60 = vadd.f32 %v458_v53, %v357_v55 }
 0x12c   :  { %v786_v56 = vpop.f32.mrf.mxu2 }
 0x12d   :  { %v678_v63 = vpop.f32.mrf.mxu1 }
 0x12e   :  { %v566_v39 = vpop.f32.mrf.mxu0 }
 0x12f   :  { %v576_v1 = vadd.f32 %v566_v39, %v466_v61 }
 0x131   :  { %v686_v4 = vadd.f32 %v676_v50, %v576_v1 }
 0x133   :  { %v796_v11 = vadd.f32 %v786_v56, %v686_v4 }
 0x134   :  { %v788_v5 = vpop.f32.mrf.mxu2 }
 0x135   :  { %v800_v16 = vmax.f32 %v796_v11, 0.0 }
 0x136   :  { %v568_v57 = vpop.f32.mrf.mxu0 }
 0x137   :  { %v577_v62 = vadd.f32 %v568_v57, %v467_v60  ;;  %v808_v26 = vmul.f32 %v804_v18, %v800_v16 }
 0x139   :  { %v687_v2 = vadd.f32 %v678_v63, %v577_v62 }
 0x13b   :  { %v797_v7 = vadd.f32 %v788_v5, %v687_v2 }
 0x13d   :  { %v461_v6 = vpop.f32.mrf.mxu3  ;;  %v801_v14 = vmax.f32 %v797_v7, 0.0 }
 0x13e   :  { %v468_v17 = vadd.f32 %v461_v6, %v358_v13 }
 0x13f   :  { %v809_v22 = vmul.f32 %v805_v15, %v801_v14 }
 0x141   :  { %v812_v29 = vmax.f32 %v808_v26, %v809_v22 }
 0x143   :  { %v813_v34 = vrot.slane %v812_v29, 4 }
 0x145   :  { %v463_v24 = vpop.f32.mrf.mxu3  ;;  %v814_v42 = vmax.f32 %v812_v29, %v813_v34 }
 0x146   :  { %v791_v19 = vpop.f32.mrf.mxu2  ;;  %v469_v30 = vadd.f32 %v463_v24, %v359_v25 }
 0x147   :  { %v815_v47 = vrot.slane %v814_v42, 2 }
 0x149   :  { %v571_v8 = vpop.f32.mrf.mxu0  ;;  %v816_v49 = vmax.f32 %v814_v42, %v815_v47 }
 0x14a   :  { %v578_v23 = vadd.f32 %v571_v8, %v468_v17 }
 0x14b   :  { %v817_v51 = vrot.slane %v816_v49, 1 }
 0x14d   :  { %v818_v54 = vmax.f32 %v816_v49, %v817_v51 }
 0x14e   :  { %v793_v36 = vpop.f32.mrf.mxu2 }
 0x151   :  { %v573_v28 = vpop.f32.mrf.mxu0 }
 0x152   :  { %v681_v20 = vpop.f32.mrf.mxu1  ;;  %v579_v31 = vadd.f32 %v573_v28, %v469_v30 }
 0x153   :  { %v688_v27 = vadd.f32 %v681_v20, %v578_v23 }
 0x155   :  { %v798_v32 = vadd.f32 %v791_v19, %v688_v27 }
 0x157   :  { %v802_v37 = vmax.f32 %v798_v32, 0.0 }
 0x159   :  { %v810_v44 = vmul.f32 %v806_v40, %v802_v37 }
 0x15a   :  { %v683_v33 = vpop.f32.mrf.mxu1 }
 0x15b   :  { %v689_v35 = vadd.f32 %v683_v33, %v579_v31 }
 0x15d   :  { %v799_v38 = vadd.f32 %v793_v36, %v689_v35 }
 0x15f   :  { %v803_v43 = vmax.f32 %v799_v38, 0.0 }
 0x161   :  { %v811_v46 = vmul.f32 %v807_v41, %v803_v43 }
 0x163   :  { %v819_v48 = vmax.f32 %v810_v44, %v811_v46 }
 0x165   :  { %v820_v39 = vrot.slane %v819_v48, 4 }
 0x167   :  { %v821_v45 = vmax.f32 %v819_v48, %v820_v39 }
 0x169   :  { %v822_v50 = vrot.slane %v821_v45, 2 }
 0x16b   :  { %v823_v52 = vmax.f32 %v821_v45, %v822_v50 }
 0x16d   :  { %v824_v53 = vrot.slane %v823_v52, 1 }
 0x16f   :  { %v825_v55 = vmax.f32 %v823_v52, %v824_v53 }
 0x171   :  { %v827_v56 = vsel %vm826_vm10, %v818_v54, %v825_v55 }
 0x172   :  { %v1199_v57 = vpack.c.bf16 %v827_v56, %v827_v56 }
 0x174   :  { %1200 = vmatmul.msk.bf16.vlgmr.msrb.gmra.mxu3 %vm1198_vm12, %v1199_v57 }
 0x1f7   :  { %v904_v58 = vpop.f32.mrf.mxu3 }
 0x1f8   :  { %908 = vst [vmem:[%s1487_s4] sm:$0xff] %v904_v58 }
 0x1ff   :  { %v906_v59 = vpop.f32.mrf.mxu3 }
 0x200   :  { %913 = vsyncpa [#allocation3], 1 }

</bundles_post_ra>
